<compile_context>
chip_gen: v5e
topology: v5e:2x2
jax: 0.10.0
libtpu: 0.0.40
codegen_flags: <defaults>
</compile_context>

<pallas_src>
import functools

import jax
import jax.numpy as jnp
from jax.experimental import pallas as pl
from jax.experimental.pallas import tpu as pltpu


@functools.lru_cache(maxsize=None)
def _dft_cos_sin(n: int, dtype_name: str):
    """Real/imag parts of the DFT matrix exp(-2*pi*i*j*k/n).

    (j*k) mod n is computed exactly in int32 (valid for n <= 46340) before
    scaling by 2*pi/n, so the trig arguments do not lose precision for
    large n the way a float32 j*k product would.
    """
    dtype = jnp.dtype(dtype_name)
    j = jnp.arange(n, dtype=jnp.int32)
    jk_mod = (j[:, None] * j[None, :]) % n                  # exact in int32
    ang = (2.0 * jnp.pi / n) * jk_mod.astype(jnp.float32)
    cos = jnp.cos(ang)
    sin = -jnp.sin(ang)                                     # exp(-i a) = cos a - i sin a
    return cos.astype(dtype), sin.astype(dtype)


def _pick_hidden_tile(h: int) -> int:
    """Largest 128-multiple divisor of h, capped at 512 (full dim otherwise)."""
    if h % 128 != 0:
        return h                      # small / irregular hidden: full extent
    for tn in (512, 384, 256, 128):
        if h % tn == 0:
            return tn
    return 128


def _fft2_real_kernel(x_ref, ch_ref, sh_ref, cs_ref, ss_ref, o_ref):
    # x_ref   : (1, S, H)   compute dtype (bf16 or f32)
    # ch_ref  : (H, TN)     cos panel for hidden-axis DFT
    # sh_ref  : (H, TN)     -sin panel for hidden-axis DFT
    # cs_ref  : (S, S)      cos matrix for seq-axis DFT
    # ss_ref  : (S, S)      -sin matrix for seq-axis DFT
    # o_ref   : (1, S, TN)  float32 output panel
    x = x_ref[0]                                              # (S, H)
    cdtype = cs_ref.dtype

    # Stage 1: hidden-axis FFT (right-multiply), f32 accumulation on the MXU.
    y_re = jnp.dot(x, ch_ref[...], preferred_element_type=jnp.float32)  # (S, TN)
    y_im = jnp.dot(x, sh_ref[...], preferred_element_type=jnp.float32)  # (S, TN)

    # Stage 2: seq-axis FFT (left-multiply); keep only the real part of the
    # complex product:  Re((C_S + i*S_S) @ (y_re + i*y_im)) = C_S@y_re - S_S@y_im
    z = (jnp.dot(cs_ref[...], y_re.astype(cdtype),
                 preferred_element_type=jnp.float32)
         - jnp.dot(ss_ref[...], y_im.astype(cdtype),
                   preferred_element_type=jnp.float32))

    o_ref[0] = z.astype(o_ref.dtype)


def fourier_fft_layer(hidden_states: jax.Array, precision: str = "bf16") -> jax.Array:
    """Pallas implementation of FNet's FourierFFTLayer forward.

    precision="bf16": bf16 operands, f32 MXU accumulation (fast path).
    precision="fp32": f32 operands end-to-end (accuracy path).
    Output is always float32 (matches `.float()` + `.real` in the torch module).
    """
    if precision not in ("bf16", "fp32"):
        raise ValueError(f"precision must be 'bf16' or 'fp32', got {precision!r}")
    compute_dtype = jnp.bfloat16 if precision == "bf16" else jnp.float32

    B, S, H = hidden_states.shape
    TN = _pick_hidden_tile(H)
    NT = H // TN

    # Cast the streamed operand once to the compute dtype (no f32 up-cast).
    x = hidden_states.astype(compute_dtype)

    cos_h, sin_h = _dft_cos_sin(H, jnp.dtype(compute_dtype).name)  # (H, H)
    cos_s, sin_s = _dft_cos_sin(S, jnp.dtype(compute_dtype).name)  # (S, S)

    out = pl.pallas_call(
        _fft2_real_kernel,
        out_shape=jax.ShapeDtypeStruct((B, S, H), jnp.float32),
        grid_spec=pltpu.PrefetchScalarGridSpec(
            num_scalar_prefetch=0,
            grid=(B, NT),
            in_specs=[
                pl.BlockSpec((1, S, H), lambda b, n: (b, 0, 0)),   # x (resident per b)
                pl.BlockSpec((H, TN), lambda b, n: (0, n)),        # cos_H panel
                pl.BlockSpec((H, TN), lambda b, n: (0, n)),        # sin_H panel
                pl.BlockSpec((S, S), lambda b, n: (0, 0)),         # cos_S (constant)
                pl.BlockSpec((S, S), lambda b, n: (0, 0)),         # sin_S (constant)
            ],
            out_specs=pl.BlockSpec((1, S, TN), lambda b, n: (b, 0, n)),
        ),
        compiler_params=pltpu.CompilerParams(
            dimension_semantics=("parallel", "parallel"),
            vmem_limit_bytes=48 * 1024 * 1024,
        ),
    )(x, cos_h, sin_h, cos_s, sin_s)
    return out


if __name__ == "__main__":
    key = jax.random.PRNGKey(0)
    B, S, H = 2, 8, 32  # (batch, seq, hidden)
    hidden_states = jax.random.normal(key, (B, S, H), dtype=jnp.float32)

    # Reference: real part of the 2-D FFT over the last two axes.
    ref = jnp.fft.fft(jnp.fft.fft(hidden_states.astype(jnp.float32), axis=-1),
                      axis=-2).real

    # Accuracy path (fp32 operands) — tight tolerance.
    out_f32 = jax.block_until_ready(fourier_fft_layer(hidden_states, precision="fp32"))
    assert out_f32.shape == ref.shape and out_f32.dtype == jnp.float32
    assert jnp.allclose(out_f32, ref, atol=1e-3, rtol=1e-3), "fp32 path mismatch"

    # Fast path (bf16 operands, f32 accumulation) — tolerance scaled to bf16.
    out_bf16 = jax.block_until_ready(fourier_fft_layer(hidden_states))
    assert out_bf16.shape == ref.shape and out_bf16.dtype == jnp.float32
    scale = float(jnp.max(jnp.abs(ref)))
    max_err = float(jnp.max(jnp.abs(out_bf16 - ref)))
    assert max_err <= 2e-2 * scale + 5e-2, f"bf16 path error too large: {max_err}"

    print("KERNEL_OK")
</pallas_src>

<mosaic_0001>
module attributes {stable_mosaic.version = 11 : i64} {
  func.func @_fft2_real_kernel(%arg0: i32, %arg1: i32, %arg2: memref<1x8x32xf32, #tpu.memory_space<vmem>>, %arg3: memref<32x32xf32, #tpu.memory_space<vmem>>, %arg4: memref<32x32xf32, #tpu.memory_space<vmem>>, %arg5: memref<8x8xf32, #tpu.memory_space<vmem>>, %arg6: memref<8x8xf32, #tpu.memory_space<vmem>>, %arg7: memref<1x8x32xf32, #tpu.memory_space<vmem>>) attributes {dimension_semantics = [#tpu.dimension_semantics<parallel>, #tpu.dimension_semantics<parallel>], iteration_bounds = array<i64: 2, 1>, scalar_prefetch = 0 : i64, scratch_operands = 0 : i64, tpu.core_type = #tpu.core_type<tc>, window_params = [{transform_indices = @transform_0, window_bounds = array<i64: 1, 8, 32>}, {transform_indices = @transform_1, window_bounds = array<i64: 32, 32>}, {transform_indices = @transform_2, window_bounds = array<i64: 32, 32>}, {pipeline_mode = #tpu.pipeline_mode<synchronous>, transform_indices = @transform_3, window_bounds = array<i64: 8, 8>}, {pipeline_mode = #tpu.pipeline_mode<synchronous>, transform_indices = @transform_4, window_bounds = array<i64: 8, 8>}, {transform_indices = @transform_5, window_bounds = array<i64: 1, 8, 32>}]} {
    %c0 = arith.constant 0 : index
    %c0_0 = arith.constant 0 : index
    %c0_1 = arith.constant 0 : index
    %0 = vector.load %arg2[%c0, %c0_0, %c0_1] : memref<1x8x32xf32, #tpu.memory_space<vmem>>, vector<1x8x32xf32>
    %1 = vector.shape_cast %0 : vector<1x8x32xf32> to vector<8x32xf32>
    %c0_2 = arith.constant 0 : index
    %c0_3 = arith.constant 0 : index
    %2 = vector.load %arg3[%c0_2, %c0_3] : memref<32x32xf32, #tpu.memory_space<vmem>>, vector<32x32xf32>
    %cst = arith.constant dense<0.000000e+00> : vector<8x32xf32>
    %3 = tpu.matmul %1, %2, %cst {dimension_numbers = #tpu.dot_dimension_numbers<[1], [0], [0], [1], [0, 0, 1, 1], [], []>} : vector<8x32xf32>, vector<32x32xf32>, vector<8x32xf32> -> vector<8x32xf32>
    %c0_4 = arith.constant 0 : index
    %c0_5 = arith.constant 0 : index
    %4 = vector.load %arg4[%c0_4, %c0_5] : memref<32x32xf32, #tpu.memory_space<vmem>>, vector<32x32xf32>
    %cst_6 = arith.constant dense<0.000000e+00> : vector<8x32xf32>
    %5 = tpu.matmul %1, %4, %cst_6 {dimension_numbers = #tpu.dot_dimension_numbers<[1], [0], [0], [1], [0, 0, 1, 1], [], []>} : vector<8x32xf32>, vector<32x32xf32>, vector<8x32xf32> -> vector<8x32xf32>
    %c0_7 = arith.constant 0 : index
    %c0_8 = arith.constant 0 : index
    %6 = vector.load %arg5[%c0_7, %c0_8] : memref<8x8xf32, #tpu.memory_space<vmem>>, vector<8x8xf32>
    %cst_9 = arith.constant dense<0.000000e+00> : vector<8x32xf32>
    %7 = tpu.matmul %6, %3, %cst_9 {dimension_numbers = #tpu.dot_dimension_numbers<[1], [0], [0], [1], [0, 0, 1, 1], [], []>} : vector<8x8xf32>, vector<8x32xf32>, vector<8x32xf32> -> vector<8x32xf32>
    %c0_10 = arith.constant 0 : index
    %c0_11 = arith.constant 0 : index
    %8 = vector.load %arg6[%c0_10, %c0_11] : memref<8x8xf32, #tpu.memory_space<vmem>>, vector<8x8xf32>
    %cst_12 = arith.constant dense<0.000000e+00> : vector<8x32xf32>
    %9 = tpu.matmul %8, %5, %cst_12 {dimension_numbers = #tpu.dot_dimension_numbers<[1], [0], [0], [1], [0, 0, 1, 1], [], []>} : vector<8x8xf32>, vector<8x32xf32>, vector<8x32xf32> -> vector<8x32xf32>
    %10 = arith.subf %7, %9 : vector<8x32xf32>
    %c0_13 = arith.constant 0 : index
    %c0_14 = arith.constant 0 : index
    %c0_15 = arith.constant 0 : index
    %11 = vector.load %arg7[%c0_13, %c0_14, %c0_15] : memref<1x8x32xf32, #tpu.memory_space<vmem>>, vector<1x8x32xf32>
    %12 = vector.shape_cast %11 : vector<1x8x32xf32> to vector<8x32xf32>
    %13 = vector.shape_cast %10 : vector<8x32xf32> to vector<1x8x32xf32>
    tpu.vector_store %arg7[%c0_13, %c0_14, %c0_15], %13 {strides = array<i32>} : memref<1x8x32xf32, #tpu.memory_space<vmem>>, vector<1x8x32xf32>,
    return
  }
  func.func @transform_0(%arg0: i32, %arg1: i32) -> (i32, i32, i32) {
    %c0_i32 = arith.constant 0 : i32
    %c0_i32_0 = arith.constant 0 : i32
    %c0_i32_1 = arith.constant 0 : i32
    return %arg0, %c0_i32, %c0_i32_0 : i32, i32, i32
  }
  func.func @transform_1(%arg0: i32, %arg1: i32) -> (i32, i32) {
    %c0_i32 = arith.constant 0 : i32
    %c0_i32_0 = arith.constant 0 : i32
    return %c0_i32, %arg1 : i32, i32
  }
  func.func @transform_2(%arg0: i32, %arg1: i32) -> (i32, i32) {
    %c0_i32 = arith.constant 0 : i32
    %c0_i32_0 = arith.constant 0 : i32
    return %c0_i32, %arg1 : i32, i32
  }
  func.func @transform_3(%arg0: i32, %arg1: i32) -> (i32, i32) {
    %c0_i32 = arith.constant 0 : i32
    %c0_i32_0 = arith.constant 0 : i32
    %c0_i32_1 = arith.constant 0 : i32
    return %c0_i32, %c0_i32_0 : i32, i32
  }
  func.func @transform_4(%arg0: i32, %arg1: i32) -> (i32, i32) {
    %c0_i32 = arith.constant 0 : i32
    %c0_i32_0 = arith.constant 0 : i32
    %c0_i32_1 = arith.constant 0 : i32
    return %c0_i32, %c0_i32_0 : i32, i32
  }
  func.func @transform_5(%arg0: i32, %arg1: i32) -> (i32, i32, i32) {
    %c0_i32 = arith.constant 0 : i32
    %c0_i32_0 = arith.constant 0 : i32
    return %arg0, %c0_i32, %arg1 : i32, i32, i32
  }
}

</mosaic_0001>

<bundles_post_ra>
// kernel: tpu_custom_call.1
= control target key start
LH: loop header
LB: loop body
LE: loop exit
PB: predicated region body
PF: predicated region fallthrough
CT: control target
= control target key end

     0   :  { %10 = vsyncpa [#allocation3], 0  ;;  %s1155_s0 = inlined_call_operand.hbm [shape: f32[2,8,32], index: 0, kind: input, shape index: {}]   ;;  %s1156_s1 = inlined_call_operand.hbm [shape: f32[32,32], index: 1, kind: input, shape index: {}]   ;;  %s1157_s2 = inlined_call_operand.hbm [shape: f32[32,32], index: 2, kind: input, shape index: {}]   ;;  %s1158_s3 = inlined_call_operand.hbm [shape: f32[8,8], index: 3, kind: input, shape index: {}]   ;;  %s1159_s4 = inlined_call_operand.hbm [shape: f32[8,8], index: 4, kind: input, shape index: {}]   ;;  %s1160_s5 = inlined_call_operand.hbm [shape: f32[2,8,32], index: 5, kind: output, shape index: {}]  }
   0x1   :  { %12 = vsyncpa [#allocation3 + $0x1], 0 }
   0x2   :  { %13 = vsyncpa [#allocation6], 0 }
   0x3   :  { %14 = vsyncpa [#allocation9], 0 }
   0x4   :  { %15 = vsyncpa [#allocation4], 0 }
   0x5   :  { %17 = vsyncpa [#allocation4 + $0x1], 0  ;;  %s982_s18 = smov 0   ;;  %s984_s19 = smov 0  }
   0x6   :  { %s986_s20 = smov 0   ;;  %s988_s21 = smov 0  }
   0x7   :  { %s990_s22 = smov 0   ;;  %s992_s23 = smov 0  }
   0x8 LB: > { %s574_s24 = sadd.s32 4294967295, %s944_s23   ;;  %p576_p0 = scmp.ge.s32.totalorder %s944_s23, 1  ;;  %s944_s23 = sphi %s992_s23, %s23_s23   ;;  %s940_s22 = sphi %s990_s22, %s1171_s22   ;;  %s936_s21 = sphi %s988_s21, %s1170_s21   ;;  %s932_s20 = sphi %s986_s20, %s1169_s20   ;;  %s928_s19 = sphi %s984_s19, %s1168_s19   ;;  %s924_s18 = sphi %s982_s18, %s1167_s18  }
   0x9   : > { %p1016_p1 = scmp.eq.s32.totalorder %s574_s24, 0  ;;  %p188_p2 = scmp.lt.s32.totalorder %s944_s23, 3 }
   0xa   : > { %s201_s28 = sshll.u32 %s1156_s1, 4  ;;  %s946_s30 = smov [#allocation5]   ;;  %s202_s28 = int_to_ptr.hbm [resolvable:$true] %s201_s28 }
   0xb   : > { %p1024_p3 = pnand %p576_p0, %p188_p2  ;;  %s203_s6 = sshll.u32 %s946_s30, 4  ;;  %s204_s6 = int_to_ptr.vmem [resolvable:$true] %s203_s6 }
   0xc   : > { %p581_p6 = scmp.ge.s32.totalorder %s944_s23, 2  ;;  %s232_s10 = sshll.u32 %s1158_s3, 4  ;;  %s233_s10 = int_to_ptr.hbm [resolvable:$true] %s232_s10 }
   0xd   : > { %p619_p4 = pneg %p1024_p3  ;;  %s947_s11 = smov 128  }
   0xe   : > { %s948_s12 = smov 8   ;;  %s949_s13 = smov [#allocation8]  }
   0xf   : > { %p1032_p5 = pnand %p619_p4, %p1016_p1  ;;  %s234_s14 = sshll.u32 %s949_s13, 4  ;;  %s235_s14 = int_to_ptr.vmem [resolvable:$true] %s234_s14 }
  0x10   : > { %s217_s17 = sshll.u32 %s1157_s2, 4  ;;  %s950_s30 = smov [#allocation7]   ;;  %s218_s17 = int_to_ptr.hbm [resolvable:$true] %s217_s17 }
  0x11   : > { %622 = dma.hbm_to_vmem [thread:$0]  (!%p1032_p5), %s202_s28, 512, %s204_s6, [#allocation6], %s947_s11, %s947_s11, %s948_s12  }
  0x12   : > { %628 = dma.hbm_to_vmem [thread:$0]  (!%p1032_p5), %s233_s10, 128, %s235_s14, [#allocation9]  }
  0x13   : > { %s244_s28 = sshll.u32 %s1159_s4, 4  ;;  %s219_s6 = sshll.u32 %s950_s30, 4  ;;  %s245_s28 = int_to_ptr.hbm [resolvable:$true] %s244_s28  ;;  %s220_s6 = int_to_ptr.vmem [resolvable:$true] %s219_s6 }
  0x14   : > { %625 = dma.hbm_to_vmem [thread:$0]  (!%p1032_p5), %s218_s17, 512, %s220_s6, [#allocation6], %s947_s11, %s947_s11, %s948_s12  }
  0x15   : > { %s951_s8 = smov [#allocation10]   ;;  %s35_s10 = sadd.s32 1, %s940_s22 }
  0x16   : > { %s246_s9 = sshll.u32 %s951_s8, 4  ;;  %s575_s13 = sadd.s32 4294967294, %s944_s23   ;;  %s247_s9 = int_to_ptr.vmem [resolvable:$true] %s246_s9 }
  0x17   : > { %631 = dma.hbm_to_vmem [thread:$0]  (!%p1032_p5), %s245_s28, 128, %s247_s9, [#allocation9]  }
  0x18   : > { %p37_p7 = scmp.ge.s32.totalorder %s35_s10, 2  ;;  %s42_s14 = sadd.s32 1, %s932_s20 }
  0x19   : > { %p49_p8 = scmp.ne.s32.totalorder %s932_s20, %s928_s19  ;;  %p50_p9 = scmp.eq.s32.totalorder %s944_s23, 0 }
  0x1a   : > { %s1173_s10 = smov (%p37_p7, %s35_s10), 0  ;;  %p55_p10 = scmp.ne.s32.totalorder %s928_s19, %s924_s18 }
  0x1b   : > { %s39_s11 = ssub.s32 %s940_s22, %s1173_s10  ;;  %p175_p11 = scmp.eq.s32.totalorder %s574_s24, 1 }
  0x1c   : > { %p40_p12 = scmp.eq.s32.totalorder %s39_s11, 0  ;;  %p1070_p13 = por %p1016_p1, %p55_p10 }
  0x1d   : > { %p1074_p0 = por %p175_p11, %p49_p8  ;;  %p181_p2 = scmp.eq.s32.totalorder %s575_s13, 1 }
  0x1e   : > { %s1079_s15 = scalar_select %p40_p12, %s932_s20, %s42_s14  }
  0x1f   : > { %p51_p4 = por %p50_p9, %p49_p8  ;;  %p1081_p5 = por %p181_p2, %p55_p10 }
  0x20   : > { %s257_s17 = sand.u32 1, %s932_s20   ;;  %s583_s24 = sshll.u32 %s940_s22, 3 }
  0x21   : > { %p644_p7 = scmp.lt.s32.totalorder %s944_s23, 2  ;;  %s582_s26 = sshll.u32 %s257_s17, 3 }
  0x22   : > { %s265_s30 = scalar_lea.hbm %s1155_s0, %s583_s24  ;;  %s261_s8 = scalar_lea.vmem [#allocation2], %s582_s26 }
  0x23   : > { %s267_s6 = sshll.u32 %s265_s30, 4  ;;  %s269_s9 = sshll.u32 %s261_s8, 4  ;;  %s268_s6 = int_to_ptr.hbm [resolvable:$true] %s267_s6  ;;  %s270_s9 = int_to_ptr.vmem [resolvable:$true] %s269_s9 }
  0x24   : > { %p633_p11 = pnand %p644_p7, %p51_p4  ;;  %s258_s13 = scalar_lea.sflag [#allocation3], %s257_s17 }
  0x25   : > { %278 = sbr.rel (%p1024_p3) target bundleno = 320 (0x140), region = 40  ;;  %s1094_s14 = sand.u32 (!%p1024_p3), 1, %s928_s19  }
  0x26   : > { %635 = dma.hbm_to_vmem [thread:$0]  (!%p633_p11), %s268_s6, 128, %s270_s9, %s258_s13  }
  0x27   : > { %s585_s11 = sshll.u32 (!%p1024_p3), %s1094_s14, 3  ;;  %s281_s24 = scalar_lea.sflag (!%p1024_p3), [#allocation3], %s1094_s14 }
  0x28   : > { %s284_s26 = scalar_lea.vmem (!%p1024_p3), [#allocation2], %s585_s11 }
  0x2a   : > { %907 = dma.done.wait (%p1070_p13), %s281_s24, 128  }
  0x2b   : > { %909 = vsyncadd (%p1070_p13), %s281_s24, 4294967168 }
  0x2c   : > { %911 = dma.done.wait (%p1016_p1), [#allocation6], 1024  }
  0x2d   : > { %913 = vsyncadd (%p1016_p1), [#allocation6], 4294966272 }
  0x2e   : > { %915 = dma.done.wait (%p1016_p1), [#allocation9], 256  }
  0x2f   : > { %917 = vsyncadd (%p1016_p1), [#allocation9], 4294967040  ;;  %v336_v0 = vld [vmem:[#allocation5 + $0x18] sm:$0xff]  ;;  %v335_v2 = vld [vmem:[#allocation5 + $0x10] sm:$0xff]  ;;  %vm337_vm0 = vcmask 261120   ;;  %vm386_vm1 = vcmask 64512  }
  0x30   : > { %v364_v1 = vld [vmem:[#allocation7 + $0x18] sm:$0xff]  ;;  %353 = vmatpush.msra.mxu0 %v336_v0  ;;  %v363_v3 = vld [vmem:[#allocation7 + $0x10] sm:$0xff]  ;;  %v334_v4 = vld [vmem:[#allocation5 + $0x8] sm:$0xff]  ;;  %s596_s25 = sshll.u32 %s936_s21, 3  ;;  %s331_s27 = scalar_lea.vmem [#allocation11], %s585_s11 }
  0x31   : > { %377 = vmatpush.msra.mxu1 %v364_v1  ;;  %v362_v5 = vld [vmem:[#allocation7 + $0x8] sm:$0xff]  ;;  %v333_v6 = vld [vmem:[#allocation5] sm:$0xff]  ;;  %v332_v8 = vld [vmem:[%s284_s26] sm:$0xff]  ;;  %s448_s17 = scalar_lea.hbm %s1160_s5, %s596_s25  ;;  %s450_s28 = sshll.u32 %s331_s27, 4  ;;  %s451_s28 = int_to_ptr.vmem [resolvable:$true] %s450_s28 }
  0x32   : > { %354 = vmatpush.msra.mxu0 %v335_v2  ;;  %v361_v7 = vld [vmem:[#allocation7] sm:$0xff]  ;;  %v410_v10 = vld [vmem:[#allocation10] sm:$0xff]  ;;  %s452_s30 = sshll.u32 %s448_s17, 4  ;;  %s437_s6 = scalar_lea.sflag [#allocation4], %s1094_s14  ;;  %s453_s30 = int_to_ptr.hbm [resolvable:$true] %s452_s30 }
  0x33   : > { %378 = vmatpush.msra.mxu1 %v363_v3  ;;  %v385_v9 = vld [vmem:[#allocation8] sm:$0xff]  ;;  %s868_s8 = sshra.s32 %s453_s30, 4  ;;  %s874_s11 = scalar_lea.hbm %s1160_s5, 16  ;;  %s869_s8 = int_to_ptr.hbm [resolvable:$true] %s868_s8 }
  0x34   : > { %355 = vmatpush.msra.mxu0 %v334_v4  ;;  %s870_s21 = scalar_lea.hbm %s869_s8, 8  ;;  %p875_p9 = scmp.lt.s32.totalorder %s869_s8, %s1160_s5 }
  0x35   : > { %379 = vmatpush.msra.mxu1 %v362_v5  ;;  %p871_p1 = scmp.ne.s32.totalorder %s869_s8, %s870_s21  ;;  %p876_p10 = scmp.lt.s32.totalorder %s874_s11, %s870_s21 }
  0x36   : > { %356 = vmatpush.msra.mxu0 %v333_v6 }
  0x37   : > { %380 = vmatpush.msra.mxu1 %v361_v7  ;;  %591 = vmatmul.msk.f32.vlgmr.msra.gmra.mxu0 %vm337_vm0, %v332_v8  ;;  %p872_p3 = pnand %p871_p1, %p1074_p0  ;;  %p877_p12 = por %p876_p10, %p875_p9 }
  0x38   : > { %592 = vmatmul.msk.f32.vlgmr.msra.gmra.mxu1 %vm337_vm0, %v332_v8 }
  0x39   : > { %p873_p8 = pneg %p872_p3 }
  0x3b   : > { %p878_p13 = pnand %p877_p12, %p873_p8 }
  0xb4   : > { %v358_v11 = vpop.f32.mrf.mxu0 }
  0xb5   : > { %v382_v12 = vpop.f32.mrf.mxu1  ;;  %405 = vmatpush.msra.mxu2 %v358_v11 }
  0xb6   : > { %429 = vmatpush.msra.mxu3 %v382_v12  ;;  %593 = vmatmul.msk.f32.vlgmr.msra.gmra.mxu2 %vm386_vm1, %v385_v9 }
  0xb7   : > { %594 = vmatmul.msk.f32.vlgmr.msra.gmra.mxu3 %vm386_vm1, %v410_v10 }
 0x139   : > { %v407_v13 = vpop.f32.mrf.mxu2 }
 0x13a   : > { %v431_v14 = vpop.f32.mrf.mxu3 }
 0x13b   : > { %v434_v15 = vsub.f32 %v407_v13, %v431_v14 }
 0x13d   : > { %435 = vst.msk [vmem:[%s331_s27] sm:$0xff] %vm337_vm0, %v434_v15 }
 0x13e   : > { %881 = shalt.err (!%p878_p13)
}
 0x13f   : > { %617 = dma.vmem_to_hbm [thread:$0]  (%p1074_p0), %s451_s28, 128, %s453_s30, %s437_s6  }
 0x140 PF: > { %s464_s14 = sand.u32 1, %s924_s18   ;;  %p637_p2 = pnand %p581_p6, %p1081_p5 }
 0x141   : > { %s465_s25 = scalar_lea.sflag [#allocation4], %s464_s14 }
 0x142   : > { %p638_p4 = pneg %p637_p2 }
 0x144   : > { %919 = dma.done.wait (%p638_p4), %s465_s25, 128  }
 0x145   : > { %921 = vsyncadd (%p638_p4), %s465_s25, 4294967168  ;;  %s23_s23 = sadd.s32 1, %s944_s23   ;;  %s1167_s18 = smov %s928_s19 }
 0x146   : > { %p20_p7 = scmp.ge.s32.totalorder %s23_s23, 4   ;;  %s1168_s19 = smov %s932_s20 }
 0x147   : > { %s1169_s20 = smov %s1079_s15  ;;  %s1170_s21 = smov %s940_s22 }
 0x148   : > { %s1171_s22 = smov %s1173_s10  ;;  %22 = sbr.rel (!%p20_p7) target bundleno = 8 (0x8), region = 103 }
 0x14d   :  { %471 = vsyncpa [#allocation3], 1 }
 0x14e   :  { %473 = vsyncpa [#allocation3 + $0x1], 1 }
 0x14f   :  { %474 = vsyncpa [#allocation6], 1 }
 0x150   :  { %475 = vsyncpa [#allocation9], 1 }
 0x151   :  { %476 = vsyncpa [#allocation4], 1 }
 0x152   :  { %478 = vsyncpa [#allocation4 + $0x1], 1 }

</bundles_post_ra>
